<compile_context>
chip_gen: v7x
topology: tpu7x:2x2x1
jax: 0.10.0
libtpu: 0.0.40
codegen_flags: <defaults>
</compile_context>

<pallas_src>
import math

import jax
import jax.numpy as jnp
from jax.experimental import pallas as pl
from jax.experimental.pallas import tpu as pltpu


# ---------------------------------------------------------------------------
# Pallas kernel: GCNConv(in_channels, 1) score layer, lane-dense output
# ---------------------------------------------------------------------------
def _score_kernel(wt_ref, xt_ref, a_ref, b_ref, s_ref, g_ref):
    # wt : (1, C)     f32   resident (constant block index -> DMA'd once)
    # xt : (C, N_pad) f32   resident
    # a  : (tn, N_pad) bf16 row block of A_hat, streamed per grid step
    # b  : (1,)       f32   bias scalar in SMEM (no padded VMEM tile for one value)
    # s,g: (1, tn)    f32   lane-dense output blocks (unmasked 128-lane stores)
    xw = jnp.dot(wt_ref[...], xt_ref[...],
                 preferred_element_type=jnp.float32)          # (1, N_pad)
    # s[0, q] = sum_j A_hat[row0+q, j] * xw[0, j]   ("NT" matmul, contract lane dims)
    s = jax.lax.dot_general(
        xw.astype(a_ref.dtype), a_ref[...],
        (((1,), (1,)), ((), ())),
        preferred_element_type=jnp.float32,
    )                                                          # (1, tn) f32
    s = s + b_ref[0]
    s_ref[...] = s
    g_ref[...] = jnp.tanh(s)          # EUP is otherwise idle here; saves a 2nd kernel


def _pick_lane_tile(n_pad, bytes_per_elem, max_tile=512, vmem_budget=12 * 1024 * 1024):
    """Largest multiple-of-128 tile dividing n_pad whose double-buffered A_hat row
    block (2 * tn * n_pad * bytes) stays well under the default scoped-VMEM limit on
    every generation (v7x: 64 MiB physical / 32 MiB default-scoped; v5e/v6e larger).
    E.g. N=8192 bf16 -> tn=256, matching the v7x guidance; tiny graphs -> tn=128."""
    tn = max_tile
    while tn > 128 and (n_pad % tn != 0 or 2 * tn * n_pad * bytes_per_elem > vmem_budget):
        tn //= 2
    return tn


def gcn_score(x, w, b, a_hat):
    """score = A_hat @ (x @ w) + b.  Returns (score, tanh(score)) as (N,) vectors,
    computed by one lane-dense, row-tiled, bf16-streamed Pallas kernel."""
    n, c = x.shape
    n_pad = ((n + 127) // 128) * 128

    # bf16 streaming halves HBM traffic of the dominant O(N^2) read; accumulation
    # stays f32 via preferred_element_type. Padding rows/cols are zero.
    a_pad = jnp.zeros((n_pad, n_pad), jnp.bfloat16).at[:n, :n].set(
        a_hat.astype(jnp.bfloat16))
    xt = jnp.zeros((c, n_pad), jnp.float32).at[:, :n].set(x.T)
    wt = w.reshape(1, c)                       # (C,1) -> (1,C), same storage order
    b = b.reshape(1).astype(jnp.float32)

    tn = _pick_lane_tile(n_pad, bytes_per_elem=2)
    grid = (n_pad // tn,)

    score_row, gate_row = pl.pallas_call(
        _score_kernel,
        out_shape=(
            jax.ShapeDtypeStruct((1, n_pad), jnp.float32),
            jax.ShapeDtypeStruct((1, n_pad), jnp.float32),
        ),
        grid_spec=pltpu.PrefetchScalarGridSpec(
            num_scalar_prefetch=0,
            grid=grid,
            in_specs=[
                pl.BlockSpec((1, c), lambda j: (0, 0)),          # w^T, resident
                pl.BlockSpec((c, n_pad), lambda j: (0, 0)),      # x^T, resident
                pl.BlockSpec((tn, n_pad), lambda j: (j, 0)),     # A_hat rows, streamed
                pl.BlockSpec(memory_space=pltpu.MemorySpace.SMEM),  # bias scalar
            ],
            out_specs=[
                pl.BlockSpec((1, tn), lambda j: (0, j)),         # lane-dense score
                pl.BlockSpec((1, tn), lambda j: (0, j)),         # lane-dense tanh
            ],
        ),
        compiler_params=pltpu.CompilerParams(
            # independent row blocks -> shard across both TensorCores on v7x
            dimension_semantics=("parallel",),
        ),
    )(wt, xt, a_pad, b)

    return score_row[0, :n], gate_row[0, :n]


# ---------------------------------------------------------------------------
# JAX glue (adjacency build, top-k, gather, edge filtering)
# ---------------------------------------------------------------------------
def build_normalized_adj(edge_index, num_nodes):
    """Dense D^-1/2 (A + I) D^-1/2 a la PyG gcn_norm.  Self-loops are only added for
    nodes that do not already have one (add_remaining_self_loops semantics)."""
    # TODO(synk): at realistic graph sizes, replace this O(N^2) dense build + matvec
    # with a scalar-prefetched segment-sum / gather Pallas kernel over edge_index.
    src, dst = edge_index[0], edge_index[1]
    a = jnp.zeros((num_nodes, num_nodes), jnp.float32)
    a = a.at[dst, src].add(1.0)                       # A[target, source]
    idx = jnp.arange(num_nodes)
    diag = a[idx, idx]
    a = a.at[idx, idx].set(jnp.where(diag > 0.0, diag, 1.0))   # keep existing loops
    deg = jnp.sum(a, axis=1)
    dinv = jnp.where(deg > 0, jax.lax.rsqrt(deg), 0.0)
    return dinv[:, None] * a * dinv[None, :]


def topk_perm(score, ratio):
    n = score.shape[0]
    k = int(math.ceil(ratio * n))                     # PyG topk: ceil(ratio * N)
    _, perm = jax.lax.top_k(score, k)                 # descending, like PyG
    return perm, k


def filter_adj(edge_index, edge_attr, perm, num_nodes):
    # TODO(synk): true filter_adj has a data-dependent output shape; keep a static
    # [2, E] edge array, remap kept nodes, compact valid edges to the front and
    # return a validity mask + count instead of shrinking the array.
    k = perm.shape[0]
    node_map = jnp.full((num_nodes,), -1, jnp.int32).at[perm].set(
        jnp.arange(k, dtype=jnp.int32)
    )
    new_src = node_map[edge_index[0]]
    new_dst = node_map[edge_index[1]]
    valid = (new_src >= 0) & (new_dst >= 0)
    order = jnp.argsort(jnp.where(valid, 0, 1))       # stable: valid edges first
    new_ei = jnp.stack([new_src[order], new_dst[order]])
    new_attr = None if edge_attr is None else edge_attr[order]
    return new_ei, new_attr, valid[order], jnp.sum(valid)


def sagpool_forward(x, edge_index, w, b, edge_attr=None, batch=None, ratio=0.8):
    n = x.shape[0]
    if batch is None:
        batch = jnp.zeros((n,), jnp.int32)

    a_hat = build_normalized_adj(edge_index, n)
    score, gate = gcn_score(x, w, b, a_hat)           # Pallas: score + tanh(score)

    perm, _ = topk_perm(score, ratio)
    # gather * gate stays in XLA: it fuses, and a (k, C<128) Pallas kernel would be
    # pure launch overhead with masked partial stores.
    x_out = x[perm] * gate[perm][:, None]
    batch_out = batch[perm]
    new_ei, new_attr, edge_mask, num_edges = filter_adj(edge_index, edge_attr, perm, n)
    return x_out, new_ei, new_attr, batch_out, perm, edge_mask, num_edges


# ---------------------------------------------------------------------------
if __name__ == "__main__":
    key = jax.random.PRNGKey(0)
    N, C, E_half = 16, 32, 20

    k_x, k_src, k_dst, k_w = jax.random.split(key, 4)
    x = jax.random.normal(k_x, (N, C), jnp.float32)

    # random undirected edge set (both directions)
    src = jax.random.randint(k_src, (E_half,), 0, N)
    dst = jax.random.randint(k_dst, (E_half,), 0, N)
    edge_index = jnp.concatenate(
        [jnp.stack([src, dst]), jnp.stack([dst, src])], axis=1
    ).astype(jnp.int32)                               # [2, 40]

    # GCNConv(in_channels, 1): glorot-like weight, zero bias (deterministic)
    w = jax.random.normal(k_w, (C, 1), jnp.float32) * (1.0 / jnp.sqrt(C))
    b = jnp.zeros((1,), jnp.float32)

    outs = sagpool_forward(x, edge_index, w, b, ratio=0.8)
    jax.block_until_ready(outs)
    x_out, new_ei, new_attr, batch_out, perm, edge_mask, num_edges = outs

    k = math.ceil(0.8 * N)
    assert x_out.shape == (k, C)
    assert perm.shape == (k,)
    assert new_ei.shape == edge_index.shape

    # numerical sanity check of the Pallas score layer vs a plain-JAX reference
    # (reference cast through bf16 to match the kernel's bf16-streamed A_hat)
    a_hat = build_normalized_adj(edge_index, N)
    score, gate = gcn_score(x, w, b, a_hat)
    xw = jnp.dot(x, w, precision=jax.lax.Precision.HIGHEST)
    xw = xw.astype(jnp.bfloat16).astype(jnp.float32)
    a_bf = a_hat.astype(jnp.bfloat16).astype(jnp.float32)
    score_ref = jnp.dot(a_bf, xw, precision=jax.lax.Precision.HIGHEST)[:, 0] + b[0]
    assert jnp.allclose(score, score_ref, atol=1e-2, rtol=1e-2)
    assert jnp.allclose(gate, jnp.tanh(score_ref), atol=1e-2, rtol=1e-2)

    print("KERNEL_OK")
</pallas_src>

<mosaic_0001>
module attributes {stable_mosaic.version = 11 : i64} {
  func.func @_score_kernel(%arg0: i32, %arg1: memref<1x32xf32, #tpu.memory_space<vmem>>, %arg2: memref<32x128xf32, #tpu.memory_space<vmem>>, %arg3: memref<128x128xbf16, #tpu.memory_space<vmem>>, %arg4: memref<1xf32, #tpu.memory_space<smem>>, %arg5: memref<1x128xf32, #tpu.memory_space<vmem>>, %arg6: memref<1x128xf32, #tpu.memory_space<vmem>>) attributes {dimension_semantics = [#tpu.dimension_semantics<parallel>], iteration_bounds = array<i64: 1>, scalar_prefetch = 0 : i64, scratch_operands = 0 : i64, tpu.core_type = #tpu.core_type<tc>, window_params = [{pipeline_mode = #tpu.pipeline_mode<synchronous>, transform_indices = @transform_0, window_bounds = array<i64: 1, 32>}, {pipeline_mode = #tpu.pipeline_mode<synchronous>, transform_indices = @transform_1, window_bounds = array<i64: 32, 128>}, {transform_indices = @transform_2, window_bounds = array<i64: 128, 128>}, {transform_indices = @transform_3, window_bounds = array<i64: 1>}, {transform_indices = @transform_4, window_bounds = array<i64: 1, 128>}, {transform_indices = @transform_5, window_bounds = array<i64: 1, 128>}]} {
    %c0 = arith.constant 0 : index
    %c0_0 = arith.constant 0 : index
    %0 = vector.load %arg1[%c0, %c0_0] : memref<1x32xf32, #tpu.memory_space<vmem>>, vector<1x32xf32>
    %c0_1 = arith.constant 0 : index
    %c0_2 = arith.constant 0 : index
    %1 = vector.load %arg2[%c0_1, %c0_2] : memref<32x128xf32, #tpu.memory_space<vmem>>, vector<32x128xf32>
    %cst = arith.constant dense<0.000000e+00> : vector<1x128xf32>
    %2 = tpu.matmul %0, %1, %cst {dimension_numbers = #tpu.dot_dimension_numbers<[1], [0], [0], [1], [0, 0, 1, 1], [], []>} : vector<1x32xf32>, vector<32x128xf32>, vector<1x128xf32> -> vector<1x128xf32>
    %3 = arith.truncf %2 : vector<1x128xf32> to vector<1x128xbf16>
    %c0_3 = arith.constant 0 : index
    %c0_4 = arith.constant 0 : index
    %4 = vector.load %arg3[%c0_3, %c0_4] : memref<128x128xbf16, #tpu.memory_space<vmem>>, vector<128x128xbf16>
    %cst_5 = arith.constant dense<0.000000e+00> : vector<1x128xf32>
    %5 = tpu.matmul %3, %4, %cst_5 {dimension_numbers = #tpu.dot_dimension_numbers<[1], [1], [0], [0], [0, 0, 1, 0], [], []>} : vector<1x128xbf16>, vector<128x128xbf16>, vector<1x128xf32> -> vector<1x128xf32>
    %c0_6 = arith.constant 0 : index
    %6 = memref.load %arg4[%c0_6] : memref<1xf32, #tpu.memory_space<smem>>
    %7 = vector.broadcast %6 : f32 to vector<1x128xf32>
    %8 = arith.addf %5, %7 : vector<1x128xf32>
    %c0_7 = arith.constant 0 : index
    %c0_8 = arith.constant 0 : index
    %9 = vector.load %arg5[%c0_7, %c0_8] : memref<1x128xf32, #tpu.memory_space<vmem>>, vector<1x128xf32>
    tpu.vector_store %arg5[%c0_7, %c0_8], %8 {strides = array<i32>} : memref<1x128xf32, #tpu.memory_space<vmem>>, vector<1x128xf32>,
    %10 = math.tanh %8 : vector<1x128xf32>
    %c0_9 = arith.constant 0 : index
    %c0_10 = arith.constant 0 : index
    %11 = vector.load %arg6[%c0_9, %c0_10] : memref<1x128xf32, #tpu.memory_space<vmem>>, vector<1x128xf32>
    tpu.vector_store %arg6[%c0_9, %c0_10], %10 {strides = array<i32>} : memref<1x128xf32, #tpu.memory_space<vmem>>, vector<1x128xf32>,
    return
  }
  func.func @transform_0(%arg0: i32) -> (i32, i32) {
    %c0_i32 = arith.constant 0 : i32
    %c0_i32_0 = arith.constant 0 : i32
    %c0_i32_1 = arith.constant 0 : i32
    return %c0_i32, %c0_i32_0 : i32, i32
  }
  func.func @transform_1(%arg0: i32) -> (i32, i32) {
    %c0_i32 = arith.constant 0 : i32
    %c0_i32_0 = arith.constant 0 : i32
    %c0_i32_1 = arith.constant 0 : i32
    return %c0_i32, %c0_i32_0 : i32, i32
  }
  func.func @transform_2(%arg0: i32) -> (i32, i32) {
    %c0_i32 = arith.constant 0 : i32
    %c0_i32_0 = arith.constant 0 : i32
    return %arg0, %c0_i32 : i32, i32
  }
  func.func @transform_3(%arg0: i32) -> i32 {
    %c0_i32 = arith.constant 0 : i32
    %c0_i32_0 = arith.constant 0 : i32
    return %c0_i32 : i32
  }
  func.func @transform_4(%arg0: i32) -> (i32, i32) {
    %c0_i32 = arith.constant 0 : i32
    %c0_i32_0 = arith.constant 0 : i32
    return %c0_i32, %arg0 : i32, i32
  }
  func.func @transform_5(%arg0: i32) -> (i32, i32) {
    %c0_i32 = arith.constant 0 : i32
    %c0_i32_0 = arith.constant 0 : i32
    return %c0_i32, %arg0 : i32, i32
  }
}

</mosaic_0001>

<bundles_post_ra>
// kernel: tpu_custom_call.1
= control target key start
LH: loop header
LB: loop body
LE: loop exit
PB: predicated region body
PF: predicated region fallthrough
CT: control target
= control target key end

     0   :  { %12 = vsyncpa [#allocation4], 0  ;;  %s542_s0 = inlined_call_operand.vmem [shape: f32[1,32], index: 0, kind: input, shape index: {}]   ;;  %s543_s1 = inlined_call_operand.hbm [shape: f32[32,128], index: 1, kind: input, shape index: {}]   ;;  %s544_s2 = inlined_call_operand.hbm [shape: bf16[128,128], index: 2, kind: input, shape index: {}]   ;;  %s545_s3 = inlined_call_operand.<no memory space> [shape: f32[1], index: 3, kind: input, shape index: {}]   ;;  %s546_s4 = inlined_call_operand.hbm [shape: f32[1,128], index: 4, kind: output, shape index: {0}]   ;;  %s547_s5 = inlined_call_operand.hbm [shape: f32[1,128], index: 5, kind: output, shape index: {1}]  }
   0x1   :  { %13 = vsyncpa [#allocation7], 0 }
   0x2   :  { %14 = vsyncpa [#allocation5], 0 }
   0x3   :  { %15 = vsyncpa [#allocation10], 0  ;;  %s447_s18 = smov [#allocation3]   ;;  %s351_s22 = scalar_lea.hbm %s543_s1, 512 }
   0x4   :  { %s23_s19 = sshll.u32 %s447_s18, 4  ;;  %p352_p0 = scmp.ne.s32.totalorder %s543_s1, %s351_s22  ;;  %s24_s19 = int_to_ptr.vmem [resolvable:$true] %s23_s19 }
   0x5   :  { %p355_p1 = scmp.lt.u32.totalorder %s351_s22, %s543_s1 }
   0x7   :  { %p357_p2 = pnand %p355_p1, %p352_p0 }
   0x9   :  { %360 = shalt.err (!%p357_p2)
}
   0xa   :  { %s361_s27 = scalar_lea.vmem %s24_s19, 512  ;;  %p366_p4 = scmp.lt.s32.totalorder %s24_s19, %s24_s19 }
   0xb   :  { %p362_p3 = scmp.ne.s32.totalorder %s24_s19, %s361_s27  ;;  %p367_p5 = scmp.lt.s32.totalorder %s361_s27, %s361_s27 }
   0xd   :  { %p368_p6 = por %p367_p5, %p366_p4 }
   0xf   :  { %p369_p7 = pnand %p368_p6, %p362_p3 }
  0x11   :  { %372 = shalt.err (!%p369_p7)
}
  0x12   :  { %s448_s28 = smov 128   ;;  %s449_s29 = smov 8  }
  0x13   :  { %29 = dma.hbm_to_vmem [thread:$0]  %s543_s1, 512, %s24_s19, [#allocation4], %s448_s28, %s448_s28, %s449_s29  }
  0x14   :  { %s450_s7 = smov [#allocation6]   ;;  %s373_s11 = scalar_lea.hbm %s544_s2, 1024 }
  0x15   :  { %s35_s8 = sshll.u32 %s450_s7, 4  ;;  %p374_p8 = scmp.ne.s32.totalorder %s544_s2, %s373_s11  ;;  %s36_s8 = int_to_ptr.vmem [resolvable:$true] %s35_s8 }
  0x16   :  { %p377_p9 = scmp.lt.u32.totalorder %s373_s11, %s544_s2 }
  0x18   :  { %p379_p10 = pnand %p377_p9, %p374_p8 }
  0x1a   :  { %382 = shalt.err (!%p379_p10)
}
  0x1b   :  { %s383_s16 = scalar_lea.vmem %s36_s8, 1024  ;;  %p388_p12 = scmp.lt.s32.totalorder %s36_s8, %s36_s8 }
  0x1c   :  { %p384_p11 = scmp.ne.s32.totalorder %s36_s8, %s383_s16  ;;  %p389_p13 = scmp.lt.s32.totalorder %s383_s16, %s383_s16 }
  0x1e   :  { %p390_p0 = por %p389_p13, %p388_p12 }
  0x20   :  { %p391_p1 = pnand %p390_p0, %p384_p11 }
  0x22   :  { %394 = shalt.err (!%p391_p1)
}
  0x23   :  { %s451_s1 = smov 64   ;;  %s452_s17 = smov 4  }
  0x24   :  { %41 = dma.hbm_to_vmem [thread:$0]  %s544_s2, 1024, %s36_s8, [#allocation7], %s451_s1, %s451_s1, %s452_s17  }
  0x25   :  { %439 = dma.done.wait [#allocation4], 512  }
  0x26   :  { %440 = vsyncadd [#allocation4], 4294966784 }
  0x27   :  { %441 = dma.done.wait [#allocation7], 1024  }
  0x28   :  { %442 = vsyncadd [#allocation7], 4294966272  ;;  %v453_v0 = vmov 0.0|0.0   ;;  %vm454_vm0 = vmmov 0   ;;  %v455_v1 = vmov 0.0   ;;  %v52_v2 = vld [vmem:[#allocation3] sm:$0xff]  ;;  %v148_v20 = vstv %s545_s3 }
  0x29   :  { %324 = vmatprep.subr.bf16.mxu0 %v453_v0  ;;  %301 = vmatprep.mubr.msk.f32.mxu0 %vm454_vm0, %v455_v1  ;;  %v53_v3 = vld [vmem:[#allocation3 + $0x8] sm:$0xff]  ;;  %v54_v4 = vld [vmem:[#allocation3 + $0x10] sm:$0xff]  ;;  %v55_v6 = vld [vmem:[#allocation3 + $0x18] sm:$0xff]  ;;  %vm56_vm1 = vcmask 261120   ;;  %s456_s22 = smov [#allocation8]  }
  0x2a   :  { %304 = vmatprep.subr.bf16.mxu1 %v455_v1  ;;  %320 = vmatprep.mubr.msk.bf16.mxu1 %vm454_vm0, %v455_v1  ;;  %v325_v5 = vpack.c.bf16 %v53_v3, %v52_v2  ;;  %v341_v7 = vld [vmem:[#allocation6] sm:$0xff]   ;;  %v328_v8 = vpack.c.bf16 %v55_v6, %v54_v4  ;;  %v342_v10 = vld [vmem:[#allocation6 + $0x8] sm:$0xff]   ;;  %v343_v11 = vld [vmem:[#allocation6 + $0x10] sm:$0xff]   ;;  %s246_s23 = sshll.u32 %s456_s22, 4  ;;  %s247_s23 = int_to_ptr.vmem [resolvable:$true] %s246_s23 }
  0x2b   :  { %305 = vmatpush3.bf16.xpose.msra.mxu1 %v341_v7  ;;  %v51_v9 = vld [vmem:[%s542_s0] sm:$0x1]  ;;  %v344_v12 = vld [vmem:[#allocation6 + $0x18] sm:$0xff]   ;;  %v346_v14 = vld [vmem:[#allocation6 + $0x28] sm:$0xff]   ;;  %s395_s24 = scalar_lea.vmem %s247_s23, 16  ;;  %s399_s25 = scalar_lea.vmem %s247_s23, 32 }
  0x2c   :  { %326 = vmatpush3.bf16.msra.mxu0 %v325_v5  ;;  %306 = vmatprep.subr.bf16.mxu1 %v455_v1  ;;  %v345_v13 = vld [vmem:[#allocation6 + $0x20] sm:$0xff]   ;;  %v347_v15 = vld [vmem:[#allocation6 + $0x30] sm:$0xff]   ;;  %v348_v16 = vld [vmem:[#allocation6 + $0x38] sm:$0xff]   ;;  %p396_p2 = scmp.ne.s32.totalorder %s247_s23, %s395_s24  ;;  %p400_p3 = scmp.lt.s32.totalorder %s247_s23, %s247_s23 }
  0x2d   :  { %327 = vmatprep.subr.bf16.mxu0 %v453_v0  ;;  %p401_p4 = scmp.lt.s32.totalorder %s399_s25, %s395_s24 }
  0x2f   :  { %p402_p5 = por %p401_p4, %p400_p3 }
  0x30   :  { %329 = vmatpush3.bf16.msra.mxu0 %v328_v8 }
  0x31   :  { %p403_p6 = pnand %p402_p5, %p396_p2 }
  0x33   :  { %302 = vmatmul.mubr.msk.f32.vlgmr.msra.gmra.mrb[0].mxu0 %vm56_vm1, %v51_v9  ;;  %307 = vmatpush3.bf16.xpose.msra.mxu1 %v342_v10 }
  0x34   :  { %308 = vmatprep.subr.bf16.mxu1 %v455_v1 }
  0x3b   :  { %309 = vmatpush3.bf16.xpose.msra.mxu1 %v343_v11 }
  0x3c   :  { %310 = vmatprep.subr.bf16.mxu1 %v455_v1 }
  0x43   :  { %311 = vmatpush3.bf16.xpose.msra.mxu1 %v344_v12 }
  0x44   :  { %312 = vmatprep.subr.bf16.mxu1 %v455_v1 }
  0x4b   :  { %313 = vmatpush3.bf16.xpose.msra.mxu1 %v345_v13 }
  0x4c   :  { %314 = vmatprep.subr.bf16.mxu1 %v455_v1 }
  0x53   :  { %315 = vmatpush3.bf16.xpose.msra.mxu1 %v346_v14 }
  0x54   :  { %316 = vmatprep.subr.bf16.mxu1 %v455_v1 }
  0x5b   :  { %317 = vmatpush3.bf16.xpose.msra.mxu1 %v347_v15 }
  0x5c   :  { %318 = vmatprep.subr.bf16.mxu1 %v455_v1 }
  0x63   :  { %319 = vmatpush3.bf16.xpose.msra.mxu1 %v348_v16 }
 0x106   :  { %v126_v17 = vpop.f32.mrb[0].mxu0 }
 0x107   :  { %v130_v18 = vpack.c.bf16 %v126_v17, %v126_v17  ;;  %v303_v19 = vpop.f32.mrb[1].mxu0 }
 0x109   :  { %321 = vmatmul.mubr.bf16.vlgmr.msra.gmra.mrb[0].mxu1 %v130_v18 }
 0x1dc   :  { %v231_v21 = vpop.f32.mrb[0].mxu1 }
 0x1dd   :  { %v232_v22 = vadd.f32 %v231_v21, %v148_v20  ;;  %v322_v23 = vpop.f32.mrb[1].mxu1 }
 0x1de   :  { %v234_v24 = vpop.f32.mrb[2].mxu1 }
 0x1df   :  { %349 = vtanh.f32 %v232_v22  ;;  %237 = vst [vmem:[#allocation8] sm:$0x1] %v232_v22  ;;  %v323_v25 = vpop.f32.mrb[3].mxu1 }
 0x1e0   :  { %406 = shalt.err (!%p403_p6)
}
 0x1e1   :  { %s407_s27 = scalar_lea.hbm %s546_s4, 16 }
 0x1e2   :  { %p408_p7 = scmp.ne.s32.totalorder %s546_s4, %s407_s27  ;;  %p411_p8 = scmp.lt.u32.totalorder %s407_s27, %s546_s4 }
 0x1e4   :  { %p413_p9 = pnand %p411_p8, %p408_p7 }
 0x1e6   :  { %416 = shalt.err (!%p413_p9)
}
 0x1e7   :  { %249 = dma.vmem_to_hbm [thread:$0]  %s247_s23, 16, %s546_s4, [#allocation5]  }
 0x1e8   :  { %s457_s9 = smov [#allocation9]  }
 0x1e9   :  { %s256_s10 = sshll.u32 %s457_s9, 4  ;;  %v350_v26 = vpop.eup %349  ;;  %s257_s10 = int_to_ptr.vmem [resolvable:$true] %s256_s10 }
 0x1ea   :  { %239 = vst [vmem:[#allocation9] sm:$0x1] %v350_v26  ;;  %s417_s11 = scalar_lea.vmem %s257_s10, 16  ;;  %s421_s12 = scalar_lea.vmem %s257_s10, 32 }
 0x1eb   :  { %p418_p10 = scmp.ne.s32.totalorder %s257_s10, %s417_s11  ;;  %p422_p11 = scmp.lt.s32.totalorder %s257_s10, %s257_s10 }
 0x1ec   :  { %p423_p12 = scmp.lt.s32.totalorder %s421_s12, %s417_s11 }
 0x1ee   :  { %p424_p13 = por %p423_p12, %p422_p11 }
 0x1f0   :  { %p425_p0 = pnand %p424_p13, %p418_p10 }
 0x1f2   :  { %428 = shalt.err (!%p425_p0)
}
 0x1f3   :  { %s429_s15 = scalar_lea.hbm %s547_s5, 16 }
 0x1f4   :  { %p430_p1 = scmp.ne.s32.totalorder %s547_s5, %s429_s15  ;;  %p433_p2 = scmp.lt.u32.totalorder %s429_s15, %s547_s5 }
 0x1f6   :  { %p435_p3 = pnand %p433_p2, %p430_p1 }
 0x1f8   :  { %438 = shalt.err (!%p435_p3)
}
 0x1f9   :  { %259 = dma.vmem_to_hbm [thread:$0]  %s257_s10, 16, %s547_s5, [#allocation10]  }
 0x1fa   :  { %443 = dma.done.wait [#allocation5], 16  }
 0x1fb   :  { %444 = vsyncadd [#allocation5], 4294967280 }
 0x1fc   :  { %445 = dma.done.wait [#allocation10], 16  }
 0x1fd   :  { %446 = vsyncadd [#allocation10], 4294967280 }
 0x1fe   :  { %266 = vsyncpa [#allocation4], 1 }
 0x1ff   :  { %267 = vsyncpa [#allocation7], 1 }
 0x200   :  { %268 = vsyncpa [#allocation5], 1 }
 0x201   :  { %269 = vsyncpa [#allocation10], 1 }

</bundles_post_ra>
